<compile_context>
chip_gen: v7x
topology: tpu7x:2x2x1
jax: 0.10.0
libtpu: 0.0.40
codegen_flags: <defaults>
</compile_context>

<pallas_src>
import math

import jax
import jax.numpy as jnp
from jax.experimental import pallas as pl
from jax.experimental.pallas import tpu as pltpu


def init_conv(x_nchw, weight_oihw, bias, drop_scale):
    """Forward pass of InitConv: Conv2d(3x3, pad=1) + bias + Dropout2d scale.

    x_nchw:      (N, Cin, H, W)
    weight_oihw: (Cout, Cin, 3, 3)   (PyTorch OIHW convention)
    bias:        (Cout,)
    drop_scale:  (N, Cout)  per-(sample, channel) Dropout2d scale
                 (keep_mask / (1 - p) in training mode, ones in eval mode).
    Returns (N, Cout, H, W).
    """
    N, Cin, H, W = x_nchw.shape
    Cout = weight_oihw.shape[0]
    K = 9 * Cin
    HW = H * W

    # Grid sizing: >= 2 parallel steps when possible (both v7x TCs busy),
    # B samples batched per step to amortize per-step overhead.
    G = 2 if (N % 2 == 0 and N >= 2) else 1
    B = N // G

    # im2col in the wrapper on the tiny Cin-channel input.  Tap ordering is
    # (c, dy, dx), matching weight_oihw.reshape(Cout, Cin * 9).
    xp = jnp.pad(x_nchw, ((0, 0), (0, 0), (1, 1), (1, 1)))
    patches = jnp.stack(
        [xp[:, :, dy:dy + H, dx:dx + W]
         for dy in range(3) for dx in range(3)],
        axis=2)                                          # (N, Cin, 9, H, W)
    patches = patches.reshape(G, B, K, HW).astype(jnp.bfloat16)

    w = weight_oihw.reshape(Cout, K).astype(jnp.bfloat16)   # free reshape
    b = bias.astype(jnp.float32).reshape(Cout, 1)
    s = drop_scale.astype(jnp.float32).reshape(G, B, Cout, 1)

    out_dtype = x_nchw.dtype

    def kernel(p_ref, w_ref, b_ref, s_ref, o_ref):
        # p_ref: (1, B, K, HW)    bf16 im2col patches (HW lane-dense)
        # w_ref: (Cout, K)        bf16 flattened conv weights
        # b_ref: (Cout, 1)        f32 bias
        # s_ref: (1, B, Cout, 1)  f32 Dropout2d per-(sample, channel) scale
        # o_ref: (1, B, Cout, HW) output, lane-dense, flattened NCHW
        w_blk = w_ref[...]
        b_blk = b_ref[...]
        for bb in range(B):       # static unroll: one MXU dot per sample
            acc = jnp.dot(w_blk, p_ref[0, bb],
                          preferred_element_type=jnp.float32)   # (Cout, HW)
            o_ref[0, bb] = ((acc + b_blk) * s_ref[0, bb]).astype(o_ref.dtype)

    flops = 2 * N * Cout * K * HW
    bytes_accessed = (N * K * HW * 2        # bf16 patches
                      + Cout * K * 2        # bf16 weights
                      + Cout * 4            # f32 bias
                      + N * Cout * 4        # f32 dropout scale
                      + N * Cout * HW * 4)  # f32 output

    out = pl.pallas_call(
        kernel,
        out_shape=jax.ShapeDtypeStruct((G, B, Cout, HW), out_dtype),
        grid=(G,),
        in_specs=[
            pl.BlockSpec((1, B, K, HW), lambda g: (g, 0, 0, 0)),
            pl.BlockSpec((Cout, K), lambda g: (0, 0)),
            pl.BlockSpec((Cout, 1), lambda g: (0, 0)),
            pl.BlockSpec((1, B, Cout, 1), lambda g: (g, 0, 0, 0)),
        ],
        out_specs=pl.BlockSpec((1, B, Cout, HW), lambda g: (g, 0, 0, 0)),
        compiler_params=pltpu.CompilerParams(
            dimension_semantics=("parallel",)),
        cost_estimate=pl.CostEstimate(
            flops=flops, transcendentals=0, bytes_accessed=bytes_accessed),
    )(patches, w, b, s)

    # (G, B, Cout, H*W) -> (N, Cout, H, W): metadata-only reshape.
    return out.reshape(N, Cout, H, W)


if __name__ == "__main__":
    key = jax.random.PRNGKey(0)
    kx, kw, kb, kd = jax.random.split(key, 4)

    # Module defaults: in_channels=1, out_channels=64, dropout=0.2
    N, Cin, H, W, Cout, p = 2, 1, 16, 16, 64, 0.2

    x = jax.random.normal(kx, (N, Cin, H, W), jnp.float32)

    # Deterministic Conv2d-style init (uniform(-1/sqrt(fan_in), 1/sqrt(fan_in))).
    fan_in = Cin * 3 * 3
    bound = 1.0 / math.sqrt(fan_in)
    weight = jax.random.uniform(kw, (Cout, Cin, 3, 3), jnp.float32,
                                minval=-bound, maxval=bound)
    bias = jax.random.uniform(kb, (Cout,), jnp.float32,
                              minval=-bound, maxval=bound)

    # Dropout2d (training mode): zero whole channels per sample with prob p,
    # scale survivors by 1/(1-p).
    # TODO(synk): Dropout2d's RNG stays host-side (passed in as a scale
    # operand); an in-kernel pltpu.prng_* variant could generate it on-chip.
    keep = jax.random.bernoulli(kd, 1.0 - p, (N, Cout)).astype(jnp.float32)
    drop_scale = keep / (1.0 - p)

    y = jax.jit(init_conv)(x, weight, bias, drop_scale)
    jax.block_until_ready(y)

    # Pure-JAX reference.  The kernel's declared precision policy is bf16
    # inputs with f32 accumulation, so quantize the conv inputs identically
    # for the reference (products of bf16-valued inputs are exact in f32).
    x_q = x.astype(jnp.bfloat16).astype(jnp.float32)
    w_q = weight.astype(jnp.bfloat16).astype(jnp.float32)
    ref = jax.lax.conv_general_dilated(
        x_q, w_q, window_strides=(1, 1), padding="SAME",
        dimension_numbers=("NCHW", "OIHW", "NCHW"))
    ref = (ref + bias[None, :, None, None]) * drop_scale[:, :, None, None]

    assert y.shape == (N, Cout, H, W)
    assert jnp.allclose(y, ref, atol=1e-2, rtol=1e-2), "mismatch vs reference"
    print("KERNEL_OK")
</pallas_src>

<mosaic_0001>
module attributes {stable_mosaic.version = 11 : i64} {
  func.func @kernel(%arg0: i32, %arg1: memref<1x1x9x256xbf16, #tpu.memory_space<vmem>>, %arg2: memref<64x9xbf16, #tpu.memory_space<vmem>>, %arg3: memref<64x1xf32, #tpu.memory_space<vmem>>, %arg4: memref<1x1x64x1xf32, #tpu.memory_space<vmem>>, %arg5: memref<1x1x64x256xf32, #tpu.memory_space<vmem>>) attributes {dimension_semantics = [#tpu.dimension_semantics<parallel>], iteration_bounds = array<i64: 2>, scalar_prefetch = 0 : i64, scratch_operands = 0 : i64, tpu.core_type = #tpu.core_type<tc>, window_params = [{transform_indices = @transform_0, window_bounds = array<i64: 1, 1, 9, 256>}, {pipeline_mode = #tpu.pipeline_mode<synchronous>, transform_indices = @transform_1, window_bounds = array<i64: 64, 9>}, {pipeline_mode = #tpu.pipeline_mode<synchronous>, transform_indices = @transform_2, window_bounds = array<i64: 64, 1>}, {transform_indices = @transform_3, window_bounds = array<i64: 1, 1, 64, 1>}, {transform_indices = @transform_4, window_bounds = array<i64: 1, 1, 64, 256>}]} {
    %c0 = arith.constant 0 : index
    %c0_0 = arith.constant 0 : index
    %0 = vector.load %arg2[%c0, %c0_0] : memref<64x9xbf16, #tpu.memory_space<vmem>>, vector<64x9xbf16>
    %c0_1 = arith.constant 0 : index
    %c0_2 = arith.constant 0 : index
    %1 = vector.load %arg3[%c0_1, %c0_2] : memref<64x1xf32, #tpu.memory_space<vmem>>, vector<64x1xf32>
    %c0_3 = arith.constant 0 : index
    %c0_4 = arith.constant 0 : index
    %c0_5 = arith.constant 0 : index
    %c0_6 = arith.constant 0 : index
    %2 = vector.load %arg1[%c0_3, %c0_4, %c0_5, %c0_6] : memref<1x1x9x256xbf16, #tpu.memory_space<vmem>>, vector<1x1x9x256xbf16>
    %3 = vector.shape_cast %2 : vector<1x1x9x256xbf16> to vector<9x256xbf16>
    %cst = arith.constant dense<0.000000e+00> : vector<64x256xf32>
    %4 = tpu.matmul %0, %3, %cst {dimension_numbers = #tpu.dot_dimension_numbers<[1], [0], [0], [1], [0, 0, 1, 1], [], []>} : vector<64x9xbf16>, vector<9x256xbf16>, vector<64x256xf32> -> vector<64x256xf32>
    %5 = vector.broadcast %1 : vector<64x1xf32> to vector<64x256xf32>
    %6 = arith.addf %4, %5 : vector<64x256xf32>
    %c0_7 = arith.constant 0 : index
    %c0_8 = arith.constant 0 : index
    %c0_9 = arith.constant 0 : index
    %c0_10 = arith.constant 0 : index
    %7 = vector.load %arg4[%c0_7, %c0_8, %c0_9, %c0_10] : memref<1x1x64x1xf32, #tpu.memory_space<vmem>>, vector<1x1x64x1xf32>
    %8 = vector.shape_cast %7 : vector<1x1x64x1xf32> to vector<64x1xf32>
    %9 = vector.broadcast %8 : vector<64x1xf32> to vector<64x256xf32>
    %10 = arith.mulf %6, %9 : vector<64x256xf32>
    %c0_11 = arith.constant 0 : index
    %c0_12 = arith.constant 0 : index
    %c0_13 = arith.constant 0 : index
    %c0_14 = arith.constant 0 : index
    %11 = vector.load %arg5[%c0_11, %c0_12, %c0_13, %c0_14] : memref<1x1x64x256xf32, #tpu.memory_space<vmem>>, vector<1x1x64x256xf32>
    %12 = vector.shape_cast %11 : vector<1x1x64x256xf32> to vector<64x256xf32>
    %13 = vector.shape_cast %10 : vector<64x256xf32> to vector<1x1x64x256xf32>
    tpu.vector_store %arg5[%c0_11, %c0_12, %c0_13, %c0_14], %13 {strides = array<i32>} : memref<1x1x64x256xf32, #tpu.memory_space<vmem>>, vector<1x1x64x256xf32>,
    return
  }
  func.func @transform_0(%arg0: i32) -> (i32, i32, i32, i32) {
    %c0_i32 = arith.constant 0 : i32
    %c0_i32_0 = arith.constant 0 : i32
    %c0_i32_1 = arith.constant 0 : i32
    %c0_i32_2 = arith.constant 0 : i32
    return %arg0, %c0_i32, %c0_i32_0, %c0_i32_1 : i32, i32, i32, i32
  }
  func.func @transform_1(%arg0: i32) -> (i32, i32) {
    %c0_i32 = arith.constant 0 : i32
    %c0_i32_0 = arith.constant 0 : i32
    %c0_i32_1 = arith.constant 0 : i32
    return %c0_i32, %c0_i32_0 : i32, i32
  }
  func.func @transform_2(%arg0: i32) -> (i32, i32) {
    %c0_i32 = arith.constant 0 : i32
    %c0_i32_0 = arith.constant 0 : i32
    %c0_i32_1 = arith.constant 0 : i32
    return %c0_i32, %c0_i32_0 : i32, i32
  }
  func.func @transform_3(%arg0: i32) -> (i32, i32, i32, i32) {
    %c0_i32 = arith.constant 0 : i32
    %c0_i32_0 = arith.constant 0 : i32
    %c0_i32_1 = arith.constant 0 : i32
    %c0_i32_2 = arith.constant 0 : i32
    return %arg0, %c0_i32, %c0_i32_0, %c0_i32_1 : i32, i32, i32, i32
  }
  func.func @transform_4(%arg0: i32) -> (i32, i32, i32, i32) {
    %c0_i32 = arith.constant 0 : i32
    %c0_i32_0 = arith.constant 0 : i32
    %c0_i32_1 = arith.constant 0 : i32
    %c0_i32_2 = arith.constant 0 : i32
    return %arg0, %c0_i32, %c0_i32_0, %c0_i32_1 : i32, i32, i32, i32
  }
}

</mosaic_0001>

<bundles_post_ra>
// kernel: init_conv.1
= control target key start
LH: loop header
LB: loop body
LE: loop exit
PB: predicated region body
PF: predicated region fallthrough
CT: control target
= control target key end

     0   :  { %s630_s15 = smov 0   ;;  %s721_s0 = inlined_call_operand.vmem [shape: bf16[2,1,9,256], index: 0, kind: input, shape index: {}]   ;;  %s722_s1 = inlined_call_operand.vmem [shape: bf16[64,9], index: 1, kind: input, shape index: {}]   ;;  %s723_s2 = inlined_call_operand.vmem [shape: f32[64,1], index: 2, kind: input, shape index: {}]   ;;  %s724_s3 = inlined_call_operand.vmem [shape: f32[2,1,64,1], index: 3, kind: input, shape index: {}]   ;;  %s725_s4 = inlined_call_operand.vmem [shape: f32[2,1,64,256], index: 4, kind: output, shape index: {}]  }
   0x1 LB: > { %s548_s16 = sadd.s32 4294967295, %s601_s15   ;;  %p552_p0 = scmp.ge.s32.totalorder %s601_s15, 1  ;;  %s601_s15 = sphi %s630_s15, %s14_s15  }
   0x2   : > { %p172_p1 = scmp.lt.s32.totalorder %s601_s15, 3 }
   0x4   : > { %p173_p2 = pnand %p552_p0, %p172_p1 }
   0x5   : > { %p203_p3 = scmp.lt.s32.totalorder (!%p173_p2), %s548_s16, 1  ;;  %vm318_vm0 = vcmask (!%p173_p2), 1043456   ;;  %v603_v0 = vmov (!%p173_p2), 0   ;;  %vm319_vm1 = vcmask (!%p173_p2), 1044480   ;;  %v604_v1 = vmov (!%p173_p2), 65535   ;;  %v229_v3 = vld [vmem:[%s723_s2 + $0x10] sm:$0xff] (!%p173_p2) }
   0x6   : > { %176 = sbr.rel (%p173_p2) target bundleno = 251 (0xfb), region = 36  ;;  %360 = vmatprep.mubr.bf16.mxu0 (!%p173_p2), %v603_v0  ;;  %380 = vmatprep.mubr.bf16.mxu1 (!%p173_p2), %v603_v0  ;;  %v320_v2 = vsel (!%p173_p2), %vm318_vm0, 4294967295, %v604_v1  ;;  %v227_v4 = vld [vmem:[%s723_s2] sm:$0xff] (!%p173_p2)  ;;  %v230_v6 = vld [vmem:[%s723_s2 + $0x18] sm:$0xff] (!%p173_p2)  ;;  %v228_v9 = vld [vmem:[%s723_s2 + $0x8] sm:$0xff] (!%p173_p2)  ;;  %vm305_vm2 = vcmask (!%p173_p2), 72704  }
   0x7   : > { %587 = vset.pattern.permute.xlu1 (!%p173_p2), %v603_v0  ;;  %586 = vset.pattern.permute.xlu0 (!%p173_p2), %v603_v0  ;;  %v321_v5 = vsel (!%p173_p2), %vm319_vm1, %v320_v2, 0  ;;  %v591_v12 = vld [vmem:[%s722_s1] sm:$0xff] (!%p173_p2)   ;;  %v592_v13 = vld [vmem:[%s722_s1 + $0x10] sm:$0xff] (!%p173_p2)   ;;  %v232_v14 = vld [vmem:[%s723_s2 + $0x28] sm:$0xff] (!%p173_p2) }
   0x8   : > { %249 = vperm.xlu1 (!%p173_p2), %587, %v229_v3   ;;  %239 = vperm.xlu0 (!%p173_p2), %586, %v227_v4   ;;  %v231_v15 = vld [vmem:[%s723_s2 + $0x20] sm:$0xff] (!%p173_p2)  ;;  %v234_v16 = vld [vmem:[%s723_s2 + $0x38] sm:$0xff] (!%p173_p2)  ;;  %v233_v17 = vld [vmem:[%s723_s2 + $0x30] sm:$0xff] (!%p173_p2) }
   0x9   : > { %v593_v18 = vld [vmem:[%s722_s1 + $0x8] sm:$0xff] (!%p173_p2)   ;;  %v594_v19 = vld [vmem:[%s722_s1 + $0x18] sm:$0xff] (!%p173_p2)  }
   0xc   : > { %254 = vperm.xlu1 (!%p173_p2), %587, %v230_v6   ;;  %244 = vperm.xlu0 (!%p173_p2), %586, %v228_v9  }
   0xd   : > { %s727_s16 = smov (!%p203_p3, %s548_s16), 1 }
   0xe   : > { %s571_s17 = sshll.u32 %s727_s16, 4  ;;  %s572_s11 = sshll.u32 %s727_s16, 6 }
   0xf   : > { %s207_s20 = scalar_lea.vmem %s721_s0, %s571_s17  ;;  %s573_s25 = sshll.u32 %s727_s16, 7 }
  0x10   : > { %v588_v7 = vld [vmem:[%s207_s20 + $0x4] ss:$8 sps:$4 sm:$0x1f]   ;;  %v590_v8 = vld [vmem:[%s207_s20] ss:$8 sps:$4 sm:$0x1f]   ;;  %264 = vperm.xlu1 %587, %v232_v14   ;;  %259 = vperm.xlu0 %586, %v231_v15   ;;  %s212_s20 = scalar_lea.vmem %s724_s3, %s572_s11  ;;  %s696_s28 = scalar_lea.vmem %s725_s4, %s573_s25 }
  0x11   : > { %v326_v10 = vand.u32 %v588_v7, %v321_v5  ;;  %v323_v11 = vand.u32 %v590_v8, %v321_v5  ;;  %v402_v20 = vld [vmem:[%s212_s20 + $0x8] sm:$0xff]  ;;  %v401_v21 = vld [vmem:[%s212_s20] sm:$0xff]  ;;  %v404_v22 = vld [vmem:[%s212_s20 + $0x18] sm:$0xff] }
  0x12   : > { %v403_v23 = vld [vmem:[%s212_s20 + $0x10] sm:$0xff]  ;;  %v406_v24 = vld [vmem:[%s212_s20 + $0x28] sm:$0xff]  ;;  %v405_v25 = vld [vmem:[%s212_s20 + $0x20] sm:$0xff] }
  0x13   : > { %328 = vmatprep.subr.bf16.mxu0 %v326_v10  ;;  %574 = vmatprep.subr.bf16.mxu1 %v326_v10  ;;  %v408_v26 = vld [vmem:[%s212_s20 + $0x38] sm:$0xff]  ;;  %v407_v27 = vld [vmem:[%s212_s20 + $0x30] sm:$0xff] }
  0x14   : > { %329 = vmatpush1.bf16.msra.mxu0 %v323_v11  ;;  %575 = vmatpush1.bf16.msra.mxu1 %v323_v11 }
  0x15   : > { %274 = vperm.xlu1 %587, %v234_v16   ;;  %269 = vperm.xlu0 %586, %v233_v17  }
  0x17   : > { %565 = vmatmul.mubr.msk.bf16.vlgmr.msra.gmra.mrb[0].mxu0 %vm305_vm2, %v591_v12  ;;  %567 = vmatmul.mubr.msk.bf16.vlgmr.msra.gmra.mrb[0].mxu1 %vm305_vm2, %v592_v13 }
  0x18   : > { %370 = vmatprep.mubr.bf16.mxu0 %v603_v0  ;;  %390 = vmatprep.mubr.bf16.mxu1 %v603_v0 }
  0x19   : > { %416 = vperm.xlu1 %587, %v402_v20   ;;  %411 = vperm.xlu0 %586, %v401_v21  }
  0x1d   : > { %426 = vperm.xlu1 %587, %v404_v22   ;;  %421 = vperm.xlu0 %586, %v403_v23  }
  0x1f   : > { %566 = vmatmul.mubr.msk.bf16.gmra.mrb[4].mxu0 %vm305_vm2, %v593_v18  ;;  %568 = vmatmul.mubr.msk.bf16.gmra.mrb[4].mxu1 %vm305_vm2, %v594_v19 }
  0x21   : > { %436 = vperm.xlu1 %587, %v406_v24   ;;  %431 = vperm.xlu0 %586, %v405_v25  }
  0x25   : > { %446 = vperm.xlu1 %587, %v408_v26   ;;  %441 = vperm.xlu0 %586, %v407_v27  }
  0x87   : > { %v240_v28 = vpop.permute.xlu0 %239  ;;  %v250_v29 = vpop.permute.xlu1 %249 }
  0x8b   : > { %v245_v30 = vpop.permute.xlu0 %244  ;;  %v688_v31 = vpop.permute.xlu1 %254 }
  0x8f   : > { %v260_v32 = vpop.permute.xlu0 %259  ;;  %v265_v33 = vpop.permute.xlu1 %264 }
  0x94   : > { %v270_v34 = vpop.permute.xlu0 %269  ;;  %v275_v35 = vpop.permute.xlu1 %274 }
  0x98   : > { %v412_v36 = vpop.permute.xlu0 %411  ;;  %v417_v37 = vpop.permute.xlu1 %416 }
  0x9c   : > { %v422_v38 = vpop.permute.xlu0 %421  ;;  %v690_v39 = vpop.permute.xlu1 %426 }
  0xa0   : > { %v432_v40 = vpop.permute.xlu0 %431  ;;  %v437_v57 = vpop.permute.xlu1 %436 }
  0xa4   : > { %v442_v2 = vpop.permute.xlu0 %441  ;;  %v447_v19 = vpop.permute.xlu1 %446 }
  0xea   : > { %v362_v41 = vpop.f32.mrb[0].mxu0  ;;  %v382_v42 = vpop.f32.mrb[0].mxu1 }
  0xeb   : > { %v363_v43 = vadd.f32 %v362_v41, %v240_v28  ;;  %v383_v44 = vadd.f32 %v382_v42, %v260_v32  ;;  %v364_v45 = vpop.f32.mrb[1].mxu0  ;;  %v384_v46 = vpop.f32.mrb[1].mxu1 }
  0xec   : > { %v365_v47 = vadd.f32 %v364_v45, %v240_v28  ;;  %v385_v48 = vadd.f32 %v384_v46, %v260_v32  ;;  %v366_v49 = vpop.f32.mrb[2].mxu0  ;;  %v386_v50 = vpop.f32.mrb[2].mxu1 }
  0xed   : > { %v449_v51 = vmul.f32 %v412_v36, %v363_v43  ;;  %v457_v52 = vmul.f32 %v432_v40, %v383_v44  ;;  %v367_v53 = vadd.f32 %v366_v49, %v245_v30  ;;  %v387_v54 = vadd.f32 %v386_v50, %v265_v33  ;;  %v368_v55 = vpop.f32.mrb[3].mxu0  ;;  %v388_v56 = vpop.f32.mrb[3].mxu1 }
  0xee   : > { %v450_v58 = vmul.f32 %v412_v36, %v365_v47  ;;  %v458_v59 = vmul.f32 %v432_v40, %v385_v48  ;;  %v369_v60 = vadd.f32 %v368_v55, %v245_v30  ;;  %v389_v61 = vadd.f32 %v388_v56, %v265_v33 }
  0xef   : > { %465 = vst [vmem:[%s696_s28] sm:$0xff] %v449_v51  ;;  %473 = vst [vmem:[%s696_s28 + $0x40] sm:$0xff] %v457_v52  ;;  %v451_v62 = vmul.f32 %v417_v37, %v367_v53  ;;  %v459_v63 = vmul.f32 %v437_v57, %v387_v54 }
  0xf0   : > { %466 = vst [vmem:[%s696_s28 + $0x8] sm:$0xff] %v450_v58  ;;  %474 = vst [vmem:[%s696_s28 + $0x48] sm:$0xff] %v458_v59  ;;  %v452_v0 = vmul.f32 %v417_v37, %v369_v60  ;;  %v460_v1 = vmul.f32 %v437_v57, %v389_v61 }
  0xf1   : > { %467 = vst [vmem:[%s696_s28 + $0x10] sm:$0xff] %v451_v62  ;;  %475 = vst [vmem:[%s696_s28 + $0x50] sm:$0xff] %v459_v63 }
  0xf2   : > { %468 = vst [vmem:[%s696_s28 + $0x18] sm:$0xff] %v452_v0  ;;  %476 = vst [vmem:[%s696_s28 + $0x58] sm:$0xff] %v460_v1  ;;  %v372_v3 = vpop.f32.mrb[4].mxu0  ;;  %v392_v4 = vpop.f32.mrb[4].mxu1 }
  0xf3   : > { %v373_v5 = vadd.f32 %v372_v3, %v250_v29  ;;  %v393_v6 = vadd.f32 %v392_v4, %v270_v34  ;;  %v374_v7 = vpop.f32.mrb[5].mxu0  ;;  %v394_v8 = vpop.f32.mrb[5].mxu1 }
  0xf4   : > { %v375_v9 = vadd.f32 %v374_v7, %v250_v29  ;;  %v395_v10 = vadd.f32 %v394_v8, %v270_v34  ;;  %v376_v11 = vpop.f32.mrb[6].mxu0  ;;  %v396_v12 = vpop.f32.mrb[6].mxu1 }
  0xf5   : > { %v453_v13 = vmul.f32 %v422_v38, %v373_v5  ;;  %v461_v14 = vmul.f32 %v442_v2, %v393_v6  ;;  %v377_v15 = vadd.f32 %v376_v11, %v688_v31  ;;  %v397_v16 = vadd.f32 %v396_v12, %v275_v35  ;;  %v378_v17 = vpop.f32.mrb[7].mxu0  ;;  %v398_v18 = vpop.f32.mrb[7].mxu1 }
  0xf6   : > { %v454_v20 = vmul.f32 %v422_v38, %v375_v9  ;;  %v462_v21 = vmul.f32 %v442_v2, %v395_v10  ;;  %v379_v22 = vadd.f32 %v378_v17, %v688_v31  ;;  %v399_v23 = vadd.f32 %v398_v18, %v275_v35 }
  0xf7   : > { %469 = vst [vmem:[%s696_s28 + $0x20] sm:$0xff] %v453_v13  ;;  %477 = vst [vmem:[%s696_s28 + $0x60] sm:$0xff] %v461_v14  ;;  %v455_v24 = vmul.f32 %v690_v39, %v377_v15  ;;  %v463_v25 = vmul.f32 %v447_v19, %v397_v16 }
  0xf8   : > { %470 = vst [vmem:[%s696_s28 + $0x28] sm:$0xff] %v454_v20  ;;  %478 = vst [vmem:[%s696_s28 + $0x68] sm:$0xff] %v462_v21  ;;  %v456_v26 = vmul.f32 %v690_v39, %v379_v22  ;;  %v464_v27 = vmul.f32 %v447_v19, %v399_v23 }
  0xf9   : > { %471 = vst [vmem:[%s696_s28 + $0x30] sm:$0xff] %v455_v24  ;;  %479 = vst [vmem:[%s696_s28 + $0x70] sm:$0xff] %v463_v25 }
  0xfa   : > { %472 = vst [vmem:[%s696_s28 + $0x38] sm:$0xff] %v456_v26  ;;  %480 = vst [vmem:[%s696_s28 + $0x78] sm:$0xff] %v464_v27 }
  0xfb PF: > { %s14_s15 = sadd.s32 1, %s601_s15  }
  0xfc   : > { %p11_p4 = scmp.ge.s32.totalorder %s14_s15, 4  }
  0xfe   :  { %13 = sbr.rel (!%p11_p4) target bundleno = 1 (0x1), region = 69 }

</bundles_post_ra>
